<compile_context>
chip_gen: v7x
topology: tpu7x:2x2x1
jax: 0.10.0
libtpu: 0.0.40
codegen_flags: <defaults>
</compile_context>

<pallas_src>
import functools

import jax
import jax.numpy as jnp
from jax import lax
from jax.experimental import pallas as pl
from jax.experimental.pallas import tpu as pltpu

BN_EPS = 1e-5
VMEM_LIMIT_BYTES = 48 * 1024 * 1024   # > default scoped limit (16/32 MiB), < v7x physical (64 MiB)


def _attn_mlp1_kernel(x_ref, wqkv_ref, bqkv_ref, w1x_ref, w1m_ref, b1_ref,
                      y1_ref, stats_ref, attn_ref,
                      *, heads, matmul_dtype, exp_dtype):
    """Per batch: fused QKV -> multi-head attention -> MLP layer-1 pre-BN (+ partial BN stats).

    Outputs:
      y1_ref    [1, N, 2D]  pre-BatchNorm activations of MLP layer 1 (stored in y1_ref.dtype)
      stats_ref [1, 2, 2D]  f32 per-batch [sum(y1), sum(y1^2)]  (one-pass BN statistics)
    Scratch:
      attn_ref  [N, D]      f32 head-contiguous attention output (merge folded into w1m_ref)
    """
    f32 = jnp.float32
    D = x_ref.shape[-1]
    dim = D // heads
    dn = (((1,), (1,)), ((), ()))   # q @ k^T : contract head_dim of both operands

    x = x_ref[0]                                  # [N, D] f32
    xm = x.astype(matmul_dtype)

    # Fused QKV projection: single MXU pass, lane-dense [N, 3D] output.
    # The 1/sqrt(head_dim) softmax scale is pre-folded into the Q columns of wqkv / bqkv.
    qkv = jnp.dot(xm, wqkv_ref[...], preferred_element_type=f32) + bqkv_ref[...]
    q = qkv[:, 0 * D:1 * D]
    k = qkv[:, 1 * D:2 * D]
    v = qkv[:, 2 * D:3 * D]

    # Per-head attention. `heads` is a small fixed constant (4); batch is the pallas grid axis.
    # Softmax normalization is deferred past P@V: multiply the [N, dim] result by the row-sum
    # reciprocal instead of scaling the [N, N] prob matrix (~N/dim fewer VALU multiplies).
    for h in range(heads):
        c0, c1 = h * dim, (h + 1) * dim
        qh = q[:, c0:c1].astype(matmul_dtype)
        kh = k[:, c0:c1].astype(matmul_dtype)
        vh = v[:, c0:c1].astype(matmul_dtype)

        s = lax.dot_general(qh, kh, dn, preferred_element_type=f32)            # [N, N] (scaled)
        e = jnp.exp((s - jnp.max(s, axis=-1, keepdims=True)).astype(exp_dtype))
        rsum = jnp.sum(e.astype(f32), axis=-1, keepdims=True)                  # [N, 1] f32
        oh = jnp.dot(e.astype(matmul_dtype), vh, preferred_element_type=f32)   # [N, dim]
        attn_ref[:, c0:c1] = oh * pl.reciprocal(rsum, approx=True)

    attn = attn_ref[...]                                                       # [N, D] head-contig

    # MLP layer 1 with the merge Conv1d and cat([x, message]) both folded away:
    #   y1 = x @ W1x  +  attn @ (Wm^T W1m)  +  (b1 + W1m^T bm)
    y1 = (jnp.dot(xm, w1x_ref[...], preferred_element_type=f32)
          + jnp.dot(attn.astype(matmul_dtype), w1m_ref[...], preferred_element_type=f32)
          + b1_ref[...])
    y1_ref[0] = y1.astype(y1_ref.dtype)

    # One-pass partial BatchNorm statistics (f32) for this batch tile.
    stats_ref[0] = jnp.concatenate(
        [jnp.sum(y1, axis=0, keepdims=True),
         jnp.sum(y1 * y1, axis=0, keepdims=True)], axis=0)


def _bn_mlp2_kernel(y1_ref, scale_ref, shift_ref, w2_ref, b2_ref, out_ref, *, matmul_dtype):
    """Per batch: apply precomputed BN scale/shift -> ReLU -> Conv1d(2D -> D)."""
    f32 = jnp.float32
    y1 = y1_ref[0].astype(f32)                              # [N, 2D]
    yn = jnp.maximum(y1 * scale_ref[...] + shift_ref[...], 0.0)
    out_ref[0] = (jnp.dot(yn.astype(matmul_dtype), w2_ref[...],
                          preferred_element_type=f32) + b2_ref[...])


def attentional_gnn_layer_nld(x, params, *, heads=4, matmul_dtype=jnp.bfloat16,
                              exp_dtype=jnp.float32, y1_dtype=jnp.bfloat16):
    """x: [B, N, D] float32 (channels-last). Returns delta: [B, N, D] float32.

    exp_dtype=jnp.bfloat16 is recommended on v6e/v7x (bf16 EUP); keep f32 on v5e.
    """
    (Wq, bq, Wk, bk, Wv, bv, Wm, bm, W1, b1, gamma, beta, W2, b2) = params
    B, N, D = x.shape
    dim = D // heads
    f32 = jnp.float32

    # torch view(B, dim, heads, N): flat channel c = d*heads + h.
    # Kernel wants head-contiguous columns j = h*dim + d  ->  perm[j] = (j%dim)*heads + j//dim.
    j = jnp.arange(D)
    perm = (j % dim) * heads + (j // dim)
    inv_sqrt_dim = 1.0 / (float(dim) ** 0.5)

    def row(v):  # bias / scale vectors as [1, C] rows (lane broadcasting), kept in f32
        return v[None, :].astype(f32)

    # Fused QKV weight [D, 3D]; softmax scale folded into the Q columns + bias.
    wqkv = jnp.concatenate([Wq[perm].T * inv_sqrt_dim, Wk[perm].T, Wv[perm].T],
                           axis=1).astype(matmul_dtype)
    bqkv = row(jnp.concatenate([bq[perm] * inv_sqrt_dim, bk[perm], bv[perm]]))

    # Fold merge Conv1d (Wm, bm) into the message half of W1 (precomputed once, in f32).
    #   message @ W1m = attn_headcontig @ (Wm[:,perm]^T @ W1m) + bm @ W1m
    w1x = W1[:, :D].T.astype(matmul_dtype)                                       # [D, 2D]
    w1m_fused = (Wm[:, perm].T.astype(f32) @ W1[:, D:].T.astype(f32))            # [D, 2D]
    b1_fused = b1.astype(f32) + W1[:, D:].astype(f32) @ bm.astype(f32)           # [2D]
    w1m = w1m_fused.astype(matmul_dtype)
    b1_r = row(b1_fused)

    w2_t = W2.T.astype(matmul_dtype)                                             # [2D, D]
    b2_r = row(b2)

    x = x.astype(f32)

    def full2(shape):  # resident (grid-invariant) 2-D operand
        return pl.BlockSpec(shape, lambda b: (0, 0))

    # ---- Kernel A: attention (+folded merge) + MLP layer-1 pre-activation + partial BN stats ----
    kernel_a = functools.partial(_attn_mlp1_kernel, heads=heads,
                                 matmul_dtype=matmul_dtype, exp_dtype=exp_dtype)
    y1, stats = pl.pallas_call(
        kernel_a,
        out_shape=(jax.ShapeDtypeStruct((B, N, 2 * D), y1_dtype),
                   jax.ShapeDtypeStruct((B, 2, 2 * D), f32)),
        grid=(B,),
        in_specs=[pl.BlockSpec((1, N, D), lambda b: (b, 0, 0)),
                  full2((D, 3 * D)), full2((1, 3 * D)),
                  full2((D, 2 * D)), full2((D, 2 * D)), full2((1, 2 * D))],
        out_specs=(pl.BlockSpec((1, N, 2 * D), lambda b: (b, 0, 0)),
                   pl.BlockSpec((1, 2, 2 * D), lambda b: (b, 0, 0))),
        scratch_shapes=[pltpu.VMEM((N, D), f32)],
        compiler_params=pltpu.CompilerParams(dimension_semantics=("parallel",),
                                             vmem_limit_bytes=VMEM_LIMIT_BYTES),
    )(x, wqkv, bqkv, w1x, w1m, b1_r)

    # Global BatchNorm statistics (training-mode, over all B*N rows) + gamma/beta fold:
    # tiny XLA reduction done ONCE, not recomputed on every Kernel-B grid step.
    count = float(B * N)
    s = jnp.sum(stats, axis=0)                                   # [2, 2D]
    mean = s[0] / count
    var = jnp.maximum(s[1] / count - mean * mean, 0.0)           # biased variance (training mode)
    inv_std = lax.rsqrt(var + BN_EPS)
    bn_scale = (gamma.astype(f32) * inv_std)[None, :]            # [1, 2D]
    bn_shift = (beta.astype(f32) - mean * gamma.astype(f32) * inv_std)[None, :]

    # ---- Kernel B: BatchNorm scale/shift + ReLU + Conv1d(2D -> D) ----
    kernel_b = functools.partial(_bn_mlp2_kernel, matmul_dtype=matmul_dtype)
    out = pl.pallas_call(
        kernel_b,
        out_shape=jax.ShapeDtypeStruct((B, N, D), f32),
        grid=(B,),
        in_specs=[pl.BlockSpec((1, N, 2 * D), lambda b: (b, 0, 0)),
                  full2((1, 2 * D)), full2((1, 2 * D)),
                  full2((2 * D, D)), full2((1, D))],
        out_specs=pl.BlockSpec((1, N, D), lambda b: (b, 0, 0)),
        compiler_params=pltpu.CompilerParams(dimension_semantics=("parallel",),
                                             vmem_limit_bytes=VMEM_LIMIT_BYTES),
    )(y1, bn_scale, bn_shift, w2_t, b2_r)

    return out


def attentional_gnn_layer(desc0, params, *, heads=4, matmul_dtype=jnp.bfloat16,
                          exp_dtype=jnp.float32, y1_dtype=jnp.bfloat16):
    """desc0: [B, D, N] float32 (PyTorch NCL). Returns delta0: [B, D, N] float32.

    When stacking many layers, call `attentional_gnn_layer_nld` directly with [B, N, D]
    activations and transpose only at the model boundary (saves one HBM round trip per layer).
    """
    x = jnp.transpose(desc0, (0, 2, 1))
    out = attentional_gnn_layer_nld(x, params, heads=heads, matmul_dtype=matmul_dtype,
                                    exp_dtype=exp_dtype, y1_dtype=y1_dtype)
    return jnp.transpose(out, (0, 2, 1))


def reference(desc0, params, *, heads=4):
    """Plain-JAX f32 mirror of the PyTorch forward (for verification)."""
    (Wq, bq, Wk, bk, Wv, bv, Wm, bm, W1, b1, gamma, beta, W2, b2) = params
    B, D, N = desc0.shape
    dim = D // heads

    def conv1d(x, w, b):  # w: [Cout, Cin]
        return jnp.einsum('oc,bcn->bon', w, x) + b[None, :, None]

    q = conv1d(desc0, Wq, bq).reshape(B, dim, heads, N)
    k = conv1d(desc0, Wk, bk).reshape(B, dim, heads, N)
    v = conv1d(desc0, Wv, bv).reshape(B, dim, heads, N)
    scores = jnp.einsum('bdhn,bdhm->bhnm', q, k) / (dim ** 0.5)
    prob = jax.nn.softmax(scores, axis=-1)
    xatt = jnp.einsum('bhnm,bdhm->bdhn', prob, v).reshape(B, D, N)
    message = conv1d(xatt, Wm, bm)
    cat = jnp.concatenate([desc0, message], axis=1)
    y1 = conv1d(cat, W1, b1)
    mean = y1.mean(axis=(0, 2), keepdims=True)
    var = y1.var(axis=(0, 2), keepdims=True)
    y1 = (y1 - mean) / jnp.sqrt(var + BN_EPS) * gamma[None, :, None] + beta[None, :, None]
    y1 = jnp.maximum(y1, 0.0)
    return conv1d(y1, W2, b2)


if __name__ == "__main__":
    B, D, N, heads = 2, 32, 16, 4

    key = jax.random.PRNGKey(0)
    ks = jax.random.split(key, 16)

    def rnd(k, shape, scale=0.1):
        return scale * jax.random.normal(k, shape, dtype=jnp.float32)

    desc0 = rnd(ks[0], (B, D, N), scale=1.0)

    # Deterministic synthetic parameters (shapes from the module __init__).
    Wq, bq = rnd(ks[1], (D, D)), rnd(ks[2], (D,))
    Wk, bk = rnd(ks[3], (D, D)), rnd(ks[4], (D,))
    Wv, bv = rnd(ks[5], (D, D)), rnd(ks[6], (D,))
    Wm, bm = rnd(ks[7], (D, D)), rnd(ks[8], (D,))
    W1, b1 = rnd(ks[9], (2 * D, 2 * D)), rnd(ks[10], (2 * D,))
    gamma = 1.0 + rnd(ks[11], (2 * D,))
    beta = rnd(ks[12], (2 * D,))
    W2 = rnd(ks[13], (D, 2 * D))
    b2 = jnp.zeros((D,), jnp.float32)          # nn.init.constant_(mlp[-1].bias, 0.0)

    params = (Wq, bq, Wk, bk, Wv, bv, Wm, bm, W1, b1, gamma, beta, W2, b2)
    ref = reference(desc0, params, heads=heads)

    # Full f32 path (f32 MXU operands, f32 y1 storage): tight check vs the f32 reference.
    out_f32 = attentional_gnn_layer(desc0, params, heads=heads,
                                    matmul_dtype=jnp.float32, y1_dtype=jnp.float32)
    jax.block_until_ready(out_f32)
    assert out_f32.shape == (B, D, N)
    err_f32 = float(jnp.max(jnp.abs(out_f32 - ref)))
    assert jnp.allclose(out_f32, ref, rtol=2e-2, atol=2e-2), err_f32

    # Default / production config: bf16 MXU operands, bf16 y1 inter-kernel storage,
    # f32 accumulation, f32 softmax & BN statistics -> looser tolerance vs the f32 reference.
    out_bf16 = attentional_gnn_layer(desc0, params, heads=heads)
    jax.block_until_ready(out_bf16)
    err_bf16 = float(jnp.max(jnp.abs(out_bf16 - ref)))
    assert jnp.allclose(out_bf16, ref, rtol=5e-2, atol=5e-2), err_bf16

    print("KERNEL_OK")
</pallas_src>

<mosaic_0001>
module attributes {stable_mosaic.version = 11 : i64} {
  func.func @_attn_mlp1_kernel(%arg0: i32, %arg1: memref<1x16x32xf32, #tpu.memory_space<vmem>>, %arg2: memref<32x96xf32, #tpu.memory_space<vmem>>, %arg3: memref<1x96xf32, #tpu.memory_space<vmem>>, %arg4: memref<32x64xf32, #tpu.memory_space<vmem>>, %arg5: memref<32x64xf32, #tpu.memory_space<vmem>>, %arg6: memref<1x64xf32, #tpu.memory_space<vmem>>, %arg7: memref<1x16x64xf32, #tpu.memory_space<vmem>>, %arg8: memref<1x2x64xf32, #tpu.memory_space<vmem>>, %arg9: memref<16x32xf32, #tpu.memory_space<vmem>>) attributes {dimension_semantics = [#tpu.dimension_semantics<parallel>], iteration_bounds = array<i64: 2>, scalar_prefetch = 0 : i64, scratch_operands = 1 : i64, tpu.core_type = #tpu.core_type<tc>, window_params = [{transform_indices = @transform_0, window_bounds = array<i64: 1, 16, 32>}, {pipeline_mode = #tpu.pipeline_mode<synchronous>, transform_indices = @transform_1, window_bounds = array<i64: 32, 96>}, {pipeline_mode = #tpu.pipeline_mode<synchronous>, transform_indices = @transform_2, window_bounds = array<i64: 1, 96>}, {pipeline_mode = #tpu.pipeline_mode<synchronous>, transform_indices = @transform_3, window_bounds = array<i64: 32, 64>}, {pipeline_mode = #tpu.pipeline_mode<synchronous>, transform_indices = @transform_4, window_bounds = array<i64: 32, 64>}, {pipeline_mode = #tpu.pipeline_mode<synchronous>, transform_indices = @transform_5, window_bounds = array<i64: 1, 64>}, {transform_indices = @transform_6, window_bounds = array<i64: 1, 16, 64>}, {transform_indices = @transform_7, window_bounds = array<i64: 1, 2, 64>}]} {
    %c0 = arith.constant 0 : index
    %c0_0 = arith.constant 0 : index
    %c0_1 = arith.constant 0 : index
    %0 = vector.load %arg1[%c0, %c0_0, %c0_1] : memref<1x16x32xf32, #tpu.memory_space<vmem>>, vector<1x16x32xf32>
    %1 = vector.shape_cast %0 : vector<1x16x32xf32> to vector<16x32xf32>
    %c0_2 = arith.constant 0 : index
    %c0_3 = arith.constant 0 : index
    %2 = vector.load %arg2[%c0_2, %c0_3] : memref<32x96xf32, #tpu.memory_space<vmem>>, vector<32x96xf32>
    %cst = arith.constant dense<0.000000e+00> : vector<16x96xf32>
    %3 = tpu.matmul %1, %2, %cst {dimension_numbers = #tpu.dot_dimension_numbers<[1], [0], [0], [1], [0, 0, 1, 1], [], []>} : vector<16x32xf32>, vector<32x96xf32>, vector<16x96xf32> -> vector<16x96xf32>
    %c0_4 = arith.constant 0 : index
    %c0_5 = arith.constant 0 : index
    %4 = vector.load %arg3[%c0_4, %c0_5] : memref<1x96xf32, #tpu.memory_space<vmem>>, vector<1x96xf32>
    %5 = vector.broadcast %4 : vector<1x96xf32> to vector<16x96xf32>
    %6 = arith.addf %3, %5 : vector<16x96xf32>
    %7 = vector.extract_strided_slice %6 {offsets = [0, 0], sizes = [16, 32], strides = [1, 1]} : vector<16x96xf32> to vector<16x32xf32>
    %8 = vector.extract_strided_slice %6 {offsets = [0, 32], sizes = [16, 32], strides = [1, 1]} : vector<16x96xf32> to vector<16x32xf32>
    %9 = vector.extract_strided_slice %6 {offsets = [0, 64], sizes = [16, 32], strides = [1, 1]} : vector<16x96xf32> to vector<16x32xf32>
    %10 = vector.extract_strided_slice %7 {offsets = [0, 0], sizes = [16, 8], strides = [1, 1]} : vector<16x32xf32> to vector<16x8xf32>
    %11 = vector.extract_strided_slice %8 {offsets = [0, 0], sizes = [16, 8], strides = [1, 1]} : vector<16x32xf32> to vector<16x8xf32>
    %12 = vector.extract_strided_slice %9 {offsets = [0, 0], sizes = [16, 8], strides = [1, 1]} : vector<16x32xf32> to vector<16x8xf32>
    %cst_6 = arith.constant dense<0.000000e+00> : vector<16x16xf32>
    %13 = tpu.matmul %10, %11, %cst_6 {dimension_numbers = #tpu.dot_dimension_numbers<[1], [1], [0], [0], [0, 0, 1, 0], [], []>} : vector<16x8xf32>, vector<16x8xf32>, vector<16x16xf32> -> vector<16x16xf32>
    %cst_7 = arith.constant dense<0xFF800000> : vector<16xf32>
    %14 = vector.multi_reduction <maximumf>, %13, %cst_7 [1] : vector<16x16xf32> to vector<16xf32>
    %15 = vector.shape_cast %14 : vector<16xf32> to vector<16x1xf32>
    %16 = vector.broadcast %15 : vector<16x1xf32> to vector<16x16xf32>
    %17 = arith.subf %13, %16 : vector<16x16xf32>
    %18 = math.exp %17 : vector<16x16xf32>
    %cst_8 = arith.constant dense<0.000000e+00> : vector<16xf32>
    %19 = vector.multi_reduction <add>, %18, %cst_8 [1] : vector<16x16xf32> to vector<16xf32>
    %20 = vector.shape_cast %19 : vector<16xf32> to vector<16x1xf32>
    %cst_9 = arith.constant dense<0.000000e+00> : vector<16x8xf32>
    %21 = tpu.matmul %18, %12, %cst_9 {dimension_numbers = #tpu.dot_dimension_numbers<[1], [0], [0], [1], [0, 0, 1, 1], [], []>} : vector<16x16xf32>, vector<16x8xf32>, vector<16x8xf32> -> vector<16x8xf32>
    %22 = tpu.reciprocal %20 {approx = true} : vector<16x1xf32> -> vector<16x1xf32>
    %23 = vector.broadcast %22 : vector<16x1xf32> to vector<16x8xf32>
    %24 = arith.mulf %21, %23 : vector<16x8xf32>
    %c0_10 = arith.constant 0 : index
    %c0_11 = arith.constant 0 : index
    %25 = vector.load %arg9[%c0_10, %c0_11] : memref<16x32xf32, #tpu.memory_space<vmem>>, vector<16x8xf32>
    tpu.vector_store %arg9[%c0_10, %c0_11], %24 {strides = array<i32>} : memref<16x32xf32, #tpu.memory_space<vmem>>, vector<16x8xf32>,
    %26 = vector.extract_strided_slice %7 {offsets = [0, 8], sizes = [16, 8], strides = [1, 1]} : vector<16x32xf32> to vector<16x8xf32>
    %27 = vector.extract_strided_slice %8 {offsets = [0, 8], sizes = [16, 8], strides = [1, 1]} : vector<16x32xf32> to vector<16x8xf32>
    %28 = vector.extract_strided_slice %9 {offsets = [0, 8], sizes = [16, 8], strides = [1, 1]} : vector<16x32xf32> to vector<16x8xf32>
    %cst_12 = arith.constant dense<0.000000e+00> : vector<16x16xf32>
    %29 = tpu.matmul %26, %27, %cst_12 {dimension_numbers = #tpu.dot_dimension_numbers<[1], [1], [0], [0], [0, 0, 1, 0], [], []>} : vector<16x8xf32>, vector<16x8xf32>, vector<16x16xf32> -> vector<16x16xf32>
    %cst_13 = arith.constant dense<0xFF800000> : vector<16xf32>
    %30 = vector.multi_reduction <maximumf>, %29, %cst_13 [1] : vector<16x16xf32> to vector<16xf32>
    %31 = vector.shape_cast %30 : vector<16xf32> to vector<16x1xf32>
    %32 = vector.broadcast %31 : vector<16x1xf32> to vector<16x16xf32>
    %33 = arith.subf %29, %32 : vector<16x16xf32>
    %34 = math.exp %33 : vector<16x16xf32>
    %cst_14 = arith.constant dense<0.000000e+00> : vector<16xf32>
    %35 = vector.multi_reduction <add>, %34, %cst_14 [1] : vector<16x16xf32> to vector<16xf32>
    %36 = vector.shape_cast %35 : vector<16xf32> to vector<16x1xf32>
    %cst_15 = arith.constant dense<0.000000e+00> : vector<16x8xf32>
    %37 = tpu.matmul %34, %28, %cst_15 {dimension_numbers = #tpu.dot_dimension_numbers<[1], [0], [0], [1], [0, 0, 1, 1], [], []>} : vector<16x16xf32>, vector<16x8xf32>, vector<16x8xf32> -> vector<16x8xf32>
    %38 = tpu.reciprocal %36 {approx = true} : vector<16x1xf32> -> vector<16x1xf32>
    %39 = vector.broadcast %38 : vector<16x1xf32> to vector<16x8xf32>
    %40 = arith.mulf %37, %39 : vector<16x8xf32>
    %c0_16 = arith.constant 0 : index
    %c8 = arith.constant 8 : index
    %41 = vector.load %arg9[%c0_16, %c8] : memref<16x32xf32, #tpu.memory_space<vmem>>, vector<16x8xf32>
    tpu.vector_store %arg9[%c0_16, %c8], %40 {strides = array<i32>} : memref<16x32xf32, #tpu.memory_space<vmem>>, vector<16x8xf32>,
    %42 = vector.extract_strided_slice %7 {offsets = [0, 16], sizes = [16, 8], strides = [1, 1]} : vector<16x32xf32> to vector<16x8xf32>
    %43 = vector.extract_strided_slice %8 {offsets = [0, 16], sizes = [16, 8], strides = [1, 1]} : vector<16x32xf32> to vector<16x8xf32>
    %44 = vector.extract_strided_slice %9 {offsets = [0, 16], sizes = [16, 8], strides = [1, 1]} : vector<16x32xf32> to vector<16x8xf32>
    %cst_17 = arith.constant dense<0.000000e+00> : vector<16x16xf32>
    %45 = tpu.matmul %42, %43, %cst_17 {dimension_numbers = #tpu.dot_dimension_numbers<[1], [1], [0], [0], [0, 0, 1, 0], [], []>} : vector<16x8xf32>, vector<16x8xf32>, vector<16x16xf32> -> vector<16x16xf32>
    %cst_18 = arith.constant dense<0xFF800000> : vector<16xf32>
    %46 = vector.multi_reduction <maximumf>, %45, %cst_18 [1] : vector<16x16xf32> to vector<16xf32>
    %47 = vector.shape_cast %46 : vector<16xf32> to vector<16x1xf32>
    %48 = vector.broadcast %47 : vector<16x1xf32> to vector<16x16xf32>
    %49 = arith.subf %45, %48 : vector<16x16xf32>
    %50 = math.exp %49 : vector<16x16xf32>
    %cst_19 = arith.constant dense<0.000000e+00> : vector<16xf32>
    %51 = vector.multi_reduction <add>, %50, %cst_19 [1] : vector<16x16xf32> to vector<16xf32>
    %52 = vector.shape_cast %51 : vector<16xf32> to vector<16x1xf32>
    %cst_20 = arith.constant dense<0.000000e+00> : vector<16x8xf32>
    %53 = tpu.matmul %50, %44, %cst_20 {dimension_numbers = #tpu.dot_dimension_numbers<[1], [0], [0], [1], [0, 0, 1, 1], [], []>} : vector<16x16xf32>, vector<16x8xf32>, vector<16x8xf32> -> vector<16x8xf32>
    %54 = tpu.reciprocal %52 {approx = true} : vector<16x1xf32> -> vector<16x1xf32>
    %55 = vector.broadcast %54 : vector<16x1xf32> to vector<16x8xf32>
    %56 = arith.mulf %53, %55 : vector<16x8xf32>
    %c0_21 = arith.constant 0 : index
    %c16 = arith.constant 16 : index
    %57 = vector.load %arg9[%c0_21, %c16] : memref<16x32xf32, #tpu.memory_space<vmem>>, vector<16x8xf32>
    tpu.vector_store %arg9[%c0_21, %c16], %56 {strides = array<i32>} : memref<16x32xf32, #tpu.memory_space<vmem>>, vector<16x8xf32>,
    %58 = vector.extract_strided_slice %7 {offsets = [0, 24], sizes = [16, 8], strides = [1, 1]} : vector<16x32xf32> to vector<16x8xf32>
    %59 = vector.extract_strided_slice %8 {offsets = [0, 24], sizes = [16, 8], strides = [1, 1]} : vector<16x32xf32> to vector<16x8xf32>
    %60 = vector.extract_strided_slice %9 {offsets = [0, 24], sizes = [16, 8], strides = [1, 1]} : vector<16x32xf32> to vector<16x8xf32>
    %cst_22 = arith.constant dense<0.000000e+00> : vector<16x16xf32>
    %61 = tpu.matmul %58, %59, %cst_22 {dimension_numbers = #tpu.dot_dimension_numbers<[1], [1], [0], [0], [0, 0, 1, 0], [], []>} : vector<16x8xf32>, vector<16x8xf32>, vector<16x16xf32> -> vector<16x16xf32>
    %cst_23 = arith.constant dense<0xFF800000> : vector<16xf32>
    %62 = vector.multi_reduction <maximumf>, %61, %cst_23 [1] : vector<16x16xf32> to vector<16xf32>
    %63 = vector.shape_cast %62 : vector<16xf32> to vector<16x1xf32>
    %64 = vector.broadcast %63 : vector<16x1xf32> to vector<16x16xf32>
    %65 = arith.subf %61, %64 : vector<16x16xf32>
    %66 = math.exp %65 : vector<16x16xf32>
    %cst_24 = arith.constant dense<0.000000e+00> : vector<16xf32>
    %67 = vector.multi_reduction <add>, %66, %cst_24 [1] : vector<16x16xf32> to vector<16xf32>
    %68 = vector.shape_cast %67 : vector<16xf32> to vector<16x1xf32>
    %cst_25 = arith.constant dense<0.000000e+00> : vector<16x8xf32>
    %69 = tpu.matmul %66, %60, %cst_25 {dimension_numbers = #tpu.dot_dimension_numbers<[1], [0], [0], [1], [0, 0, 1, 1], [], []>} : vector<16x16xf32>, vector<16x8xf32>, vector<16x8xf32> -> vector<16x8xf32>
    %70 = tpu.reciprocal %68 {approx = true} : vector<16x1xf32> -> vector<16x1xf32>
    %71 = vector.broadcast %70 : vector<16x1xf32> to vector<16x8xf32>
    %72 = arith.mulf %69, %71 : vector<16x8xf32>
    %c0_26 = arith.constant 0 : index
    %c24 = arith.constant 24 : index
    %73 = vector.load %arg9[%c0_26, %c24] : memref<16x32xf32, #tpu.memory_space<vmem>>, vector<16x8xf32>
    tpu.vector_store %arg9[%c0_26, %c24], %72 {strides = array<i32>} : memref<16x32xf32, #tpu.memory_space<vmem>>, vector<16x8xf32>,
    %c0_27 = arith.constant 0 : index
    %c0_28 = arith.constant 0 : index
    %74 = vector.load %arg9[%c0_27, %c0_28] : memref<16x32xf32, #tpu.memory_space<vmem>>, vector<16x32xf32>
    %c0_29 = arith.constant 0 : index
    %c0_30 = arith.constant 0 : index
    %75 = vector.load %arg4[%c0_29, %c0_30] : memref<32x64xf32, #tpu.memory_space<vmem>>, vector<32x64xf32>
    %cst_31 = arith.constant dense<0.000000e+00> : vector<16x64xf32>
    %76 = tpu.matmul %1, %75, %cst_31 {dimension_numbers = #tpu.dot_dimension_numbers<[1], [0], [0], [1], [0, 0, 1, 1], [], []>} : vector<16x32xf32>, vector<32x64xf32>, vector<16x64xf32> -> vector<16x64xf32>
    %c0_32 = arith.constant 0 : index
    %c0_33 = arith.constant 0 : index
    %77 = vector.load %arg5[%c0_32, %c0_33] : memref<32x64xf32, #tpu.memory_space<vmem>>, vector<32x64xf32>
    %cst_34 = arith.constant dense<0.000000e+00> : vector<16x64xf32>
    %78 = tpu.matmul %74, %77, %cst_34 {dimension_numbers = #tpu.dot_dimension_numbers<[1], [0], [0], [1], [0, 0, 1, 1], [], []>} : vector<16x32xf32>, vector<32x64xf32>, vector<16x64xf32> -> vector<16x64xf32>
    %79 = arith.addf %76, %78 : vector<16x64xf32>
    %c0_35 = arith.constant 0 : index
    %c0_36 = arith.constant 0 : index
    %80 = vector.load %arg6[%c0_35, %c0_36] : memref<1x64xf32, #tpu.memory_space<vmem>>, vector<1x64xf32>
    %81 = vector.broadcast %80 : vector<1x64xf32> to vector<16x64xf32>
    %82 = arith.addf %79, %81 : vector<16x64xf32>
    %c0_37 = arith.constant 0 : index
    %c0_38 = arith.constant 0 : index
    %c0_39 = arith.constant 0 : index
    %83 = vector.load %arg7[%c0_37, %c0_38, %c0_39] : memref<1x16x64xf32, #tpu.memory_space<vmem>>, vector<1x16x64xf32>
    %84 = vector.shape_cast %83 : vector<1x16x64xf32> to vector<16x64xf32>
    %85 = vector.shape_cast %82 : vector<16x64xf32> to vector<1x16x64xf32>
    tpu.vector_store %arg7[%c0_37, %c0_38, %c0_39], %85 {strides = array<i32>} : memref<1x16x64xf32, #tpu.memory_space<vmem>>, vector<1x16x64xf32>,
    %cst_40 = arith.constant dense<0.000000e+00> : vector<64xf32>
    %86 = vector.multi_reduction <add>, %82, %cst_40 [0] : vector<16x64xf32> to vector<64xf32>
    %87 = vector.shape_cast %86 : vector<64xf32> to vector<1x64xf32>
    %88 = arith.mulf %82, %82 : vector<16x64xf32>
    %cst_41 = arith.constant dense<0.000000e+00> : vector<64xf32>
    %89 = vector.multi_reduction <add>, %88, %cst_41 [0] : vector<16x64xf32> to vector<64xf32>
    %90 = vector.shape_cast %89 : vector<64xf32> to vector<1x64xf32>
    %91 = tpu.concatenate %87, %90 in 0 : vector<1x64xf32>, vector<1x64xf32> -> vector<2x64xf32>
    %c0_42 = arith.constant 0 : index
    %c0_43 = arith.constant 0 : index
    %c0_44 = arith.constant 0 : index
    %92 = vector.load %arg8[%c0_42, %c0_43, %c0_44] : memref<1x2x64xf32, #tpu.memory_space<vmem>>, vector<1x2x64xf32>
    %93 = vector.shape_cast %92 : vector<1x2x64xf32> to vector<2x64xf32>
    %94 = vector.shape_cast %91 : vector<2x64xf32> to vector<1x2x64xf32>
    tpu.vector_store %arg8[%c0_42, %c0_43, %c0_44], %94 {strides = array<i32>} : memref<1x2x64xf32, #tpu.memory_space<vmem>>, vector<1x2x64xf32>,
    return
  }
  func.func @transform_0(%arg0: i32) -> (i32, i32, i32) {
    %c0_i32 = arith.constant 0 : i32
    %c0_i32_0 = arith.constant 0 : i32
    %c0_i32_1 = arith.constant 0 : i32
    return %arg0, %c0_i32, %c0_i32_0 : i32, i32, i32
  }
  func.func @transform_1(%arg0: i32) -> (i32, i32) {
    %c0_i32 = arith.constant 0 : i32
    %c0_i32_0 = arith.constant 0 : i32
    %c0_i32_1 = arith.constant 0 : i32
    return %c0_i32, %c0_i32_0 : i32, i32
  }
  func.func @transform_2(%arg0: i32) -> (i32, i32) {
    %c0_i32 = arith.constant 0 : i32
    %c0_i32_0 = arith.constant 0 : i32
    %c0_i32_1 = arith.constant 0 : i32
    return %c0_i32, %c0_i32_0 : i32, i32
  }
  func.func @transform_3(%arg0: i32) -> (i32, i32) {
    %c0_i32 = arith.constant 0 : i32
    %c0_i32_0 = arith.constant 0 : i32
    %c0_i32_1 = arith.constant 0 : i32
    return %c0_i32, %c0_i32_0 : i32, i32
  }
  func.func @transform_4(%arg0: i32) -> (i32, i32) {
    %c0_i32 = arith.constant 0 : i32
    %c0_i32_0 = arith.constant 0 : i32
    %c0_i32_1 = arith.constant 0 : i32
    return %c0_i32, %c0_i32_0 : i32, i32
  }
  func.func @transform_5(%arg0: i32) -> (i32, i32) {
    %c0_i32 = arith.constant 0 : i32
    %c0_i32_0 = arith.constant 0 : i32
    %c0_i32_1 = arith.constant 0 : i32
    return %c0_i32, %c0_i32_0 : i32, i32
  }
  func.func @transform_6(%arg0: i32) -> (i32, i32, i32) {
    %c0_i32 = arith.constant 0 : i32
    %c0_i32_0 = arith.constant 0 : i32
    %c0_i32_1 = arith.constant 0 : i32
    return %arg0, %c0_i32, %c0_i32_0 : i32, i32, i32
  }
  func.func @transform_7(%arg0: i32) -> (i32, i32, i32) {
    %c0_i32 = arith.constant 0 : i32
    %c0_i32_0 = arith.constant 0 : i32
    %c0_i32_1 = arith.constant 0 : i32
    return %arg0, %c0_i32, %c0_i32_0 : i32, i32, i32
  }
}

</mosaic_0001>

<bundles_post_ra>
// kernel: tpu_custom_call.1
= control target key start
LH: loop header
LB: loop body
LE: loop exit
PB: predicated region body
PF: predicated region fallthrough
CT: control target
= control target key end

     0   :  { %13 = vsyncpa [#allocation4], 0  ;;  %s2806_s0 = inlined_call_operand.hbm [shape: f32[2,16,32], index: 0, kind: input, shape index: {}]   ;;  %s2807_s1 = inlined_call_operand.hbm [shape: f32[32,96], index: 1, kind: input, shape index: {}]   ;;  %s2808_s2 = inlined_call_operand.vmem [shape: f32[1,96], index: 2, kind: input, shape index: {}]   ;;  %s2809_s3 = inlined_call_operand.hbm [shape: f32[32,64], index: 3, kind: input, shape index: {}]   ;;  %s2810_s4 = inlined_call_operand.hbm [shape: f32[32,64], index: 4, kind: input, shape index: {}]   ;;  %s2811_s5 = inlined_call_operand.vmem [shape: f32[1,64], index: 5, kind: input, shape index: {}]   ;;  %s2812_s6 = inlined_call_operand.hbm [shape: f32[2,16,64], index: 6, kind: output, shape index: {0}]   ;;  %s2813_s7 = inlined_call_operand.hbm [shape: f32[2,2,64], index: 7, kind: output, shape index: {1}]  }
   0x1   :  { %15 = vsyncpa [#allocation4 + $0x1], 0 }
   0x2   :  { %16 = vsyncpa [#allocation7], 0 }
   0x3   :  { %17 = vsyncpa [#allocation10], 0 }
   0x4   :  { %18 = vsyncpa [#allocation5], 0 }
   0x5   :  { %20 = vsyncpa [#allocation5 + $0x1], 0 }
   0x6   :  { %21 = vsyncpa [#allocation13], 0 }
   0x7   :  { %23 = vsyncpa [#allocation13 + $0x1], 0  ;;  %s2368_s24 = smov 0   ;;  %s2370_s25 = smov 0  }
   0x8   :  { %s2372_s26 = smov 0   ;;  %s2374_s27 = smov 0  }
   0x9 LB: > { %s2389_s28 = sadd.s32 4294967295, %s2303_s27   ;;  %s1650_s29 = sadd.s32 4294967294, %s2303_s27   ;;  %s2303_s27 = sphi %s2374_s27, %s2841_s27   ;;  %s2299_s26 = sphi %s2372_s26, %s2840_s26   ;;  %s2295_s25 = sphi %s2370_s25, %s2839_s25   ;;  %s2291_s24 = sphi %s2368_s24, %s2838_s24  }
   0xa   : > { %p49_p0 = scmp.ne.s32.totalorder %s2295_s25, %s2291_s24  ;;  %p2814_p1 = scmp.eq.s32.totalorder %s2389_s28, 0 }
   0xb   : > { %p184_p3 = scmp.eq.s32.totalorder %s1650_s29, 1  ;;  %p1651_p5 = scmp.ge.s32.totalorder %s2303_s27, 1 }
   0xc   : > { %p2398_p4 = por %p2814_p1, %p49_p0  ;;  %p217_p7 = scmp.lt.s32.totalorder %s2303_s27, 3 }
   0xd   : > { %p2403_p6 = por %p184_p3, %p49_p0  ;;  %s2305_s10 = smov [#allocation6]  }
   0xe   : > { %s2818_s30 = scalar_select %p2398_p4, 1, 0 }
   0xf   : > { %s2819_s8 = scalar_select %p2403_p6, 1, 0 }
  0x10   : > { %p2408_p8 = pnand %p1651_p5, %p217_p7  ;;  %s229_s11 = sshll.u32 %s2305_s10, 4  ;;  %s2412_s11 = int_to_ptr.vmem [resolvable:$true] %s229_s11 }
  0x11   : > { %2820 = sst [smem:[#allocation19_spill]] %s2819_s8  ;;  %s2306_s13 = smov [#allocation8]  }
  0x12   : > { %s2821_s9 = scalar_select %p2408_p8, 1, 0 }
  0x13   : > { %p1930_p9 = pneg %p2408_p8  ;;  %s245_s14 = sshll.u32 %s2306_s13, 4  ;;  %s2423_s14 = int_to_ptr.vmem [resolvable:$true] %s245_s14 }
  0x14   : > { %s2307_s15 = smov [#allocation9]   ;;  %s2083_s19 = scalar_lea.hbm %s2807_s1, 512 }
  0x15   : > { %p2419_p11 = pnand %p1930_p9, %p2814_p1  ;;  %s2425_s16 = sshll.u32 %s2307_s15, 4  ;;  %s259_s16 = int_to_ptr.vmem [resolvable:$true] %s2425_s16 }
  0x16   : > { %p2084_p12 = scmp.ne.s32.totalorder %s2807_s1, %s2083_s19  ;;  %p2090_p5 = scmp.lt.u32.totalorder %s2083_s19, %s2807_s1 }
  0x17   : > { %p2435_p13 = pneg %p2419_p11 }
  0x19   : > { %p2086_p0 = pnand %p2435_p13, %p2084_p12 }
  0x1b   : > { %p2087_p3 = pneg %p2086_p0 }
  0x1d   : > { %p2092_p7 = pnand %p2090_p5, %p2087_p3 }
  0x1f   : > { %2095 = shalt.err (!%p2092_p7)
}
  0x20   : > { %s2096_s10 = scalar_lea.vmem %s2412_s11, 512  ;;  %p2104_p2 = scmp.lt.s32.totalorder %s2412_s11, %s2412_s11 }
  0x21   : > { %p2097_p9 = scmp.ne.s32.totalorder %s2412_s11, %s2096_s10  ;;  %p2105_p6 = scmp.lt.s32.totalorder %s2096_s10, %s2096_s10 }
  0x23   : > { %p2099_p10 = pnand %p2097_p9, %p2435_p13  ;;  %p2106_p12 = por %p2105_p6, %p2104_p2 }
  0x25   : > { %p2100_p1 = pneg %p2099_p10 }
  0x27   : > { %p2107_p0 = pnand %p2106_p12, %p2100_p1 }
  0x29   : > { %2110 = shalt.err (!%p2107_p0)
}
  0x2a   : > { %s2308_s13 = smov 128   ;;  %s2309_s15 = smov 8  }
  0x2b   : > { %1933 = dma.hbm_to_vmem [thread:$0]  (!%p2419_p11), %s2807_s1, 512, %s2412_s11, [#allocation7], %s2308_s13, %s2308_s13, %s2309_s15  }
  0x2c   : > { %s2111_s21 = scalar_lea.hbm %s2809_s3, 512 }
  0x2d   : > { %p2112_p1 = scmp.ne.s32.totalorder %s2809_s3, %s2111_s21  ;;  %p2118_p10 = scmp.lt.u32.totalorder %s2111_s21, %s2809_s3 }
  0x2f   : > { %p2114_p2 = pnand %p2112_p1, %p2435_p13 }
  0x31   : > { %p2115_p6 = pneg %p2114_p2 }
  0x33   : > { %p2120_p3 = pnand %p2118_p10, %p2115_p6 }
  0x35   : > { %2123 = shalt.err (!%p2120_p3)
}
  0x36   : > { %s2124_s11 = scalar_lea.vmem %s2423_s14, 512  ;;  %p2132_p12 = scmp.lt.s32.totalorder %s2423_s14, %s2423_s14 }
  0x37   : > { %p2125_p5 = scmp.ne.s32.totalorder %s2423_s14, %s2124_s11  ;;  %p2133_p0 = scmp.lt.s32.totalorder %s2124_s11, %s2124_s11 }
  0x39   : > { %p2127_p7 = pnand %p2125_p5, %p2435_p13  ;;  %p2134_p1 = por %p2133_p0, %p2132_p12 }
  0x3b   : > { %p2128_p9 = pneg %p2127_p7 }
  0x3d   : > { %p2135_p2 = pnand %p2134_p1, %p2128_p9 }
  0x3f   : > { %2138 = shalt.err (!%p2135_p2)
}
  0x40   : > { %1936 = dma.hbm_to_vmem [thread:$0]  (!%p2419_p11), %s2809_s3, 512, %s2423_s14, [#allocation7], %s2308_s13, %s2308_s13, %s2309_s15  }
  0x41   : > { %s2139_s20 = scalar_lea.hbm %s2810_s4, 512 }
  0x42   : > { %p2140_p6 = scmp.ne.s32.totalorder %s2810_s4, %s2139_s20  ;;  %p2146_p5 = scmp.lt.u32.totalorder %s2139_s20, %s2810_s4 }
  0x44   : > { %p2142_p10 = pnand %p2140_p6, %p2435_p13 }
  0x46   : > { %p2143_p3 = pneg %p2142_p10 }
  0x48   : > { %p2148_p7 = pnand %p2146_p5, %p2143_p3 }
  0x4a   : > { %2151 = shalt.err (!%p2148_p7)
}
  0x4b   : > { %s2152_s11 = scalar_lea.vmem %s259_s16, 512  ;;  %p2160_p1 = scmp.lt.s32.totalorder %s259_s16, %s259_s16 }
  0x4c   : > { %p2153_p9 = scmp.ne.s32.totalorder %s259_s16, %s2152_s11  ;;  %p2161_p2 = scmp.lt.s32.totalorder %s2152_s11, %s2152_s11 }
  0x4e   : > { %p2155_p12 = pnand %p2153_p9, %p2435_p13  ;;  %p2162_p4 = por %p2161_p2, %p2160_p1 }
  0x50   : > { %p2156_p0 = pneg %p2155_p12 }
  0x52   : > { %p2163_p8 = pnand %p2162_p4, %p2156_p0 }
  0x54   : > { %2166 = shalt.err (!%p2163_p8)
}
  0x55   : > { %1939 = dma.hbm_to_vmem [thread:$0]  (!%p2419_p11), %s2810_s4, 512, %s259_s16, [#allocation10], %s2308_s13, %s2308_s13, %s2309_s15  }
  0x56   : > { %s2508_s22 = sadd.s32 1, %s2303_s27   ;;  %s36_s17 = sadd.s32 1, %s2299_s26 }
  0x57   : > { %s33_s12 = ssub.s32 %s2303_s27, %s2508_s22  ;;  %p43_p8 = scmp.ne.s32.totalorder %s2299_s26, %s2295_s25 }
  0x58   : > { %p34_p4 = scmp.eq.s32.totalorder %s33_s12, 0  ;;  %p44_p13 = scmp.eq.s32.totalorder %s2303_s27, 0 }
  0x59   : > { %p1954_p6 = scmp.lt.s32.totalorder %s2303_s27, 2  ;;  %p2824_p3 = scmp.eq.s32.totalorder %s2389_s28, 1 }
  0x5a   : > { %s2518_s18 = scalar_select %p34_p4, %s2299_s26, %s36_s17  }
  0x5b   : > { %p45_p10 = por %p44_p13, %p43_p8  ;;  %p2522_p5 = por %p2824_p3, %p43_p8 }
  0x5c   : > { %s275_s20 = sand.u32 1, %s2299_s26   ;;  %s1705_s21 = sshll.u32 %s2303_s27, 8 }
  0x5d   : > { %s1656_s16 = sshll.u32 %s275_s20, 4  ;;  %s2531_s10 = scalar_lea.hbm %s2806_s0, %s1705_s21 }
  0x5e   : > { %s279_s11 = scalar_lea.vmem [#allocation3], %s1656_s16  ;;  %p2533_p11 = pnand %p1954_p6, %p45_p10 }
  0x5f   : > { %s286_s14 = sshll.u32 %s279_s11, 4  ;;  %s2539_s12 = scalar_lea.sflag [#allocation4], %s275_s20  ;;  %s2537_s14 = int_to_ptr.vmem [resolvable:$true] %s286_s14 }
  0x60   : > { %s2167_s17 = scalar_lea.hbm %s2531_s10, 256  ;;  %p2169_p9 = pneg %p2533_p11 }
  0x61   : > { %p2168_p7 = scmp.ne.s32.totalorder %s2531_s10, %s2167_s17  ;;  %s2172_s23 = scalar_lea.hbm %s2806_s0, 512 }
  0x62   : > { %p2173_p1 = scmp.lt.u32.totalorder %s2531_s10, %s2806_s0  ;;  %p2174_p2 = scmp.lt.u32.totalorder %s2172_s23, %s2167_s17 }
  0x63   : > { %p2170_p12 = pnand %p2169_p9, %p2168_p7  ;;  %p2176_p8 = scmp.lt.u32.totalorder %s2167_s17, %s2531_s10 }
  0x64   : > { %p2175_p4 = por %p2174_p2, %p2173_p1 }
  0x65   : > { %p2171_p0 = pneg %p2170_p12 }
  0x66   : > { %p2177_p13 = por %p2176_p8, %p2175_p4 }
  0x68   : > { %p2178_p6 = pnand %p2177_p13, %p2171_p0 }
  0x6a   : > { %2181 = shalt.err (!%p2178_p6)
}
  0x6b   : > { %s2182_s20 = scalar_lea.vmem %s2537_s14, 256  ;;  %s2310_s21 = smov [#allocation3]  }
  0x6c   : > { %p2183_p10 = scmp.ne.s32.totalorder %s2537_s14, %s2182_s20  ;;  %s2187_s16 = sshll.u32 %s2310_s21, 4  ;;  %s2188_s16 = int_to_ptr.vmem [resolvable:$false] %s2187_s16 }
  0x6d   : > { %s2189_s29 = scalar_lea.vmem %s2188_s16, 512  ;;  %p2190_p12 = scmp.lt.s32.totalorder %s2537_s14, %s2188_s16 }
  0x6e   : > { %p2185_p3 = pnand %p2183_p10, %p2169_p9  ;;  %p2191_p1 = scmp.lt.s32.totalorder %s2189_s29, %s2182_s20 }
  0x70   : > { %p2186_p7 = pneg %p2185_p3  ;;  %p2192_p2 = por %p2191_p1, %p2190_p12 }
  0x72   : > { %p2193_p4 = pnand %p2192_p2, %p2186_p7 }
  0x74   : > { %2196 = shalt.err (!%p2193_p4)
}
  0x75   : > { %1943 = dma.hbm_to_vmem [thread:$0]  (!%p2533_p11), %s2531_s10, 256, %s2537_s14, %s2539_s12, %s2308_s13, %s2308_s13, %s2309_s15  }
  0x76   : > { %p2827_p9 = scmp.ne.s32.totalorder %s2821_s9, 0 }
  0x77   : > { %s2573_s17 = sand.u32 (!%p2827_p9), 1, %s2295_s25   ;;  %p2828_p0 = scmp.ne.s32.totalorder (!%p2827_p9), %s2818_s30, 0 }
  0x78   : > { %298 = sbr.rel (%p2827_p9) target bundleno = 2243 (0x8c3), region = 44  ;;  %s1660_s23 = sshll.u32 (!%p2827_p9), %s2573_s17, 4 }
  0x79   : > { %s301_s11 = scalar_lea.sflag (!%p2827_p9), [#allocation4], %s2573_s17  ;;  %s304_s8 = scalar_lea.vmem (!%p2827_p9), [#allocation3], %s1660_s23 }
  0x7f   : > { %2270 = dma.done.wait (%p2828_p0), %s301_s11, 256  }
  0x80   : > { %2272 = vsyncadd (%p2828_p0), %s301_s11, 4294967040  ;;  %p2829_p11 = scmp.eq.s32.totalorder %s2389_s28, 0 }
  0x82   : > { %2274 = dma.done.wait (%p2829_p11), [#allocation7], 1024   ;;  %p2830_p8 = pmov %p2829_p11 }
  0x84   : > { %2276 = vsyncadd (%p2830_p8), [#allocation7], 4294966272  ;;  %p2831_p13 = pmov %p2830_p8 }
  0x85   : > { %p2832_p6 = pmov %p2830_p8 }
  0x86   : > { %2278 = dma.done.wait (%p2831_p13), [#allocation10], 512  }
  0x87   : > { %2280 = vsyncadd (%p2832_p6), [#allocation10], 4294966784  ;;  %vm365_vm0 = vcmask 261120   ;;  %v354_v0 = vld [vmem:[#allocation6] sm:$0xff]  ;;  %v355_v1 = vld [vmem:[#allocation6 + $0x8] sm:$0xff]  ;;  %vm453_vm1 = vcmask 64512  }
  0x88   : > { %v356_v2 = vld [vmem:[#allocation6 + $0x10] sm:$0xff]  ;;  %v1846_v3 = vpack.c.bf16 %v355_v1, %v354_v0  ;;  %v357_v4 = vld [vmem:[#allocation6 + $0x18] sm:$0xff]  ;;  %s2311_s13 = smov 120   ;;  %s2312_s15 = smov 96   ;;  %vm2619_vm2 = vmpackc.low %vm453_vm1, %vm453_vm1  ;;  %vm537_vm3 = vcmask 130048   ;;  %vm857_vm4 = vcmask 130112  }
  0x89   : > { %v2591_v5 = vld [vmem:[%s304_s8] sm:$0xff]  ;;  %v1850_v6 = vpack.c.bf16 %v357_v4, %v356_v2  ;;  %v2595_v7 = vld [vmem:[%s304_s8 + $0x8] sm:$0xff]  ;;  %s2313_s10 = smov 88   ;;  %s2314_s14 = smov 64   ;;  %vm1068_vm5 = vcmask 195712   ;;  %vm1279_vm6 = vcmask 261312  }
  0x8a   : > { %1765 = vmatprep.mubr.msk.f32.mxu1 %vm365_vm0, %v2591_v5  ;;  %1847 = vmatprep.subr.bf16.mxu1 %v1846_v3  ;;  %v1666_v8 = vld [vmem:[%s2808_s2] ss:$0 sm:$0xff]  ;;  %s2315_s12 = smov 80   ;;  %s2316_s20 = smov 112   ;;  %vm1457_vm7 = vcmask 523264  }
  0x8b   : > { %1849 = vmatpush3.bf16.msra.mxu1 %v1846_v3  ;;  %s2317_s21 = smov 72   ;;  %s2318_s16 = smov 56  }
  0x8c   : > { %1851 = vmatprep.subr.bf16.mxu1 %v1850_v6  ;;  %s2319_s29 = smov 104   ;;  %s2320_s11 = smov 48  }
  0x8d   : > { %s2321_s8 = smov 40   ;;  %s2322_s30 = smov 16  }
  0x8e   : > { %s2323_s9 = smov 8  }
  0x8f   : > { %1853 = vmatpush3.bf16.msra.mxu1 %v1850_v6 }
  0x92   : > { %1766 = vmatmul.mubr.msk.f32.vlgmr.msra.gmra.mrb[0].mxu1 %vm365_vm0, %v2595_v7 }
 0x165   : > { %v1767_v9 = vpop.f32.mrb[0].mxu1 }
 0x166   : > { %v2602_v10 = vadd.f32 %v1767_v9, %v1666_v8  ;;  %v438_v11 = vpop.f32.mrb[1].mxu1 }
 0x167   : > { %v2604_v12 = vadd.f32 %v1666_v8, %v438_v11 }
 0x169   : > { %649 = vrot.lane.b32.xlu1 %v2604_v12, %s2311_s13  ;;  %1772 = vmatprep.mubr.msk.f32.mxu1 %vm453_vm1, %v2604_v12  ;;  %v2611_v13 = vpack.i.bf16 %v2602_v10, %v2604_v12 }
 0x16b   : > { %2012 = vrot.lane.b32.xlu0 %v2611_v13, %s2312_s15 }
 0x16d   : > { %651 = vrot.lane.b32.xlu1 %v2602_v10, %s2311_s13  ;;  %s2324_s13 = smov 24  }
 0x16f   : > { %2017 = vrot.lane.b32.xlu0 %v2611_v13, %s2313_s10 }
 0x171   : > { %2022 = vrot.lane.b32.xlu1 %v2611_v13, %s2314_s14  ;;  %s344_s14 = scalar_lea.vmem [#allocation11], %s1660_s23  ;;  %s1485_s23 = scalar_lea.sflag [#allocation5], %s2573_s17 }
 0x1db   : > { %v650_v14 = vpop.permute.xlu1 %649 }
 0x1dd   : > { %v2013_v15 = vpop.permute.xlu0 %2012 }
 0x1de   : > { %v2015_v16 = vunpack.i.h.bf16 %v2013_v15  ;;  %v2014_v17 = vunpack.i.l.bf16 %v2013_v15 }
 0x1df   : > { %v652_v18 = vpop.permute.xlu1 %651 }
 0x1e0   : > { %v1854_v20 = vpack.c.bf16 %v2015_v16, %v2014_v17 }
 0x1e1   : > { %v2018_v21 = vpop.permute.xlu0 %2017 }
 0x1e2   : > { %v2020_v22 = vunpack.i.h.bf16 %v2018_v21  ;;  %v2019_v23 = vunpack.i.l.bf16 %v2018_v21  ;;  %1856 = vmatprep.subr.msk.bf16.mxu1 %vm2619_vm2, %v1854_v20 }
 0x1e3   : > { %v2023_v24 = vpop.permute.xlu1 %2022  ;;  %1859 = vmatpush3.bf16.xpose.msk.msra.mxu1 %vm2619_vm2, %v1854_v20 }
 0x1e4   : > { %v1864_v25 = vpack.c.bf16 %v2020_v22, %v2019_v23  ;;  %v2025_v26 = vunpack.i.h.bf16 %v2023_v24  ;;  %v2024_v27 = vunpack.i.l.bf16 %v2023_v24 }
 0x1e6   : > { %1866 = vmatprep.subr.msk.bf16.mxu1 %vm2619_vm2, %v1864_v25  ;;  %v1860_v28 = vpack.c.bf16 %v2025_v26, %v2024_v27 }
 0x1e8   : > { %1861 = vmatprep.subr.bf16.mxu0 %v1860_v28 }
 0x1e9   : > { %1863 = vmatpush3.bf16.msra.mxu0 %v1860_v28 }
 0x1ea   : > { %1773 = vmatmul.mubr.msk.f32.vlgmr.msra.gmra.mrb[2].mxu1 %vm453_vm1, %v2602_v10 }
 0x1eb   : > { %1869 = vmatpush3.bf16.xpose.msk.msra.mxu1 %vm2619_vm2, %v1864_v25  ;;  %1786 = vmatprep.mubr.msk.f32.mxu1 %vm453_vm1, %v650_v14 }
 0x1f2   : > { %1787 = vmatmul.mubr.msk.f32.vlgmr.msra.gmra.mrb[4].mxu1 %vm453_vm1, %v652_v18 }
 0x2bd   : > { %v1774_v29 = vpop.f32.mrb[2].mxu1 }
 0x2be   : > { %v528_v30 = vpop.f32.mrb[3].mxu1  ;;  %v541_v31 = vsel %vm537_vm3, %v1774_v29, -inf }
 0x2bf   : > { %542 = vmax.xlane.f32.xlu1 %v541_v31  ;;  %v538_v32 = vsel %vm537_vm3, %v528_v30, -inf }
 0x2c0   : > { %539 = vmax.xlane.f32.xlu0 %v538_v32 }
 0x2c5   : > { %v1788_v33 = vpop.f32.mrb[4].mxu1 }
 0x2c6   : > { %v731_v34 = vpop.f32.mrb[5].mxu1  ;;  %v743_v35 = vsel %vm537_vm3, %v1788_v33, -inf }
 0x2c7   : > { %744 = vmax.xlane.f32.xlu0 %v743_v35  ;;  %v740_v36 = vsel %vm537_vm3, %v731_v34, -inf }
 0x2cb   : > { %741 = vmax.xlane.f32.xlu0 %v740_v36 }
 0x2d0   : > { %2032 = vrot.lane.b32.xlu1 %v2611_v13, %s2315_s12  ;;  %s1503_s12 = sshll.u32 %s344_s14, 4  ;;  %s2719_s12 = int_to_ptr.vmem [resolvable:$true] %s1503_s12 }
 0x2d4   : > { %860 = vrot.lane.b32.xlu1 %v2604_v12, %s2316_s20 }
 0x2d8   : > { %2042 = vrot.lane.b32.xlu1 %v2611_v13, %s2317_s21 }
 0x2e1   : > { %2027 = vrot.lane.b32.xlu0 %v2611_v13, %s2318_s16 }
 0x2e5   : > { %862 = vrot.lane.b32.xlu0 %v2602_v10, %s2316_s20  ;;  %s1706_s20 = sshll.u32 %s2389_s28, 8 }
 0x34c   : > { %v543_v37 = vpop.xlane.xlu1 %542 }
 0x34d   : > { %v545_v38 = vsub.f32 %v1774_v29, %v543_v37  ;;  %v540_v39 = vpop.xlane.xlu0 %539 }
 0x34e   : > { %v544_v40 = vsub.f32 %v528_v30, %v540_v39 }
 0x34f   : > { %v548_v41 = vmul.f32 1.442695, %v545_v38 }
 0x350   : > { %v546_v42 = vmul.f32 1.442695, %v544_v40  ;;  %v2033_v46 = vpop.permute.xlu1 %2032 }
 0x351   : > { %v2035_v51 = vunpack.i.h.bf16 %v2033_v46  ;;  %v2034_v54 = vunpack.i.l.bf16 %v2033_v46 }
 0x352   : > { %2051 = vpow2.f32 %v546_v42 }
 0x353   : > { %2053 = vpow2.f32 %v548_v41  ;;  %v1874_v58 = vpack.c.bf16 %v2035_v51, %v2034_v54 }
 0x354   : > { %v745_v43 = vpop.xlane.xlu0 %744  ;;  %v861_v61 = vpop.permute.xlu1 %860 }
 0x355   : > { %v747_v44 = vsub.f32 %v1788_v33, %v745_v43 }
 0x357   : > { %v750_v48 = vmul.f32 1.442695, %v747_v44 }
 0x358   : > { %v742_v45 = vpop.xlane.xlu0 %741  ;;  %v2043_v9 = vpop.permute.xlu1 %2042 }
 0x359   : > { %v746_v47 = vsub.f32 %v731_v34, %v742_v45  ;;  %v2045_v21 = vunpack.i.h.bf16 %v2043_v9  ;;  %v2044_v22 = vunpack.i.l.bf16 %v2043_v9 }
 0x35b   : > { %v748_v49 = vmul.f32 1.442695, %v746_v47  ;;  %v1884_v25 = vpack.c.bf16 %v2045_v21, %v2044_v22  ;;  %v1289_v21 = vld [vmem:[#allocation9 + $0x8] sm:$0xff] }
 0x35c   : > { %v2644_v50 = vpop.eup %2051  ;;  %v2028_v52 = vpop.permute.xlu0 %2027 }
 0x35d   : > { %v2646_v53 = vpop.eup %2053  ;;  %2055 = vpow2.f32 %v748_v49  ;;  %v2030_v55 = vunpack.i.h.bf16 %v2028_v52  ;;  %v2029_v56 = vunpack.i.l.bf16 %v2028_v52  ;;  %1779 = vmatprep.mubr.msk.f32.mxu0 %vm537_vm3, %v2644_v50  ;;  %v550_v38 = vsel %vm537_vm3, %v2644_v50, 0.0 }
 0x35e   : > { %2057 = vpow2.f32 %v750_v48  ;;  %1780 = vmatmul.mubr.msk.f32.vlgmr.msra.gmra.mrb[0].mxu0 %vm537_vm3, %v2646_v53 }
 0x35f   : > { %v1870_v57 = vpack.c.bf16 %v2030_v55, %v2029_v56 }
 0x360   : > { %v863_v62 = vpop.permute.xlu0 %862 }
 0x361   : > { %1871 = vmatprep.subr.bf16.mxu0 %v1870_v57 }
 0x362   : > { %1873 = vmatpush3.bf16.msra.mxu0 %v1870_v57  ;;  %v553_v57 = vsel %vm537_vm3, %v2646_v53, 0.0 }
 0x363   : > { %1876 = vmatprep.subr.msk.bf16.mxu0 %vm2619_vm2, %v1874_v58 }
 0x367   : > { %v2056_v59 = vpop.eup %2055 }
 0x368   : > { %v2058_v60 = vpop.eup %2057  ;;  %1793 = vmatprep.mubr.msk.f32.mxu0 %vm537_vm3, %v2056_v59  ;;  %v752_v35 = vsel %vm537_vm3, %v2056_v59, 0.0 }
 0x369   : > { %1794 = vmatmul.mubr.msk.f32.vlgmr.msra.gmra.mrb[2].mxu0 %vm537_vm3, %v2058_v60  ;;  %v755_v19 = vsel %vm537_vm3, %v2058_v60, 0.0 }
 0x36a   : > { %1800 = vmatprep.mubr.msk.f32.mxu0 %vm453_vm1, %v861_v61 }
 0x36b   : > { %1879 = vmatpush3.bf16.xpose.msk.msra.mxu0 %vm2619_vm2, %v1874_v58 }
 0x372   : > { %1801 = vmatmul.mubr.msk.f32.vlgmr.msra.gmra.mrb[4].mxu0 %vm453_vm1, %v863_v62 }
 0x431   : > { %v2660_v63 = vpop.f32.mrb[0].mxu0 }
 0x432   : > { %v2662_v0 = vpop.f32.mrb[1].mxu0 }
 0x43c   : > { %v2664_v1 = vpop.f32.mrb[2].mxu0 }
 0x43d   : > { %v2666_v2 = vpop.f32.mrb[3].mxu0 }
 0x445   : > { %v1802_v3 = vpop.f32.mrb[4].mxu0 }
 0x446   : > { %v942_v4 = vpop.f32.mrb[5].mxu0  ;;  %v954_v6 = vsel %vm537_vm3, %v1802_v3, -inf }
 0x447   : > { %955 = vmax.xlane.f32.xlu0 %v954_v6  ;;  %v951_v8 = vsel %vm537_vm3, %v942_v4, -inf }
 0x448   : > { %952 = vmax.xlane.f32.xlu1 %v951_v8 }
 0x459   : > { %1071 = vrot.lane.b32.xlu1 %v2604_v12, %s2319_s29 }
 0x45d   : > { %2037 = vrot.lane.b32.xlu0 %v2611_v13, %s2320_s11  ;;  %s2197_s11 = scalar_lea.vmem %s2719_s12, 256 }
 0x45e   : > { %p2198_p10 = scmp.ne.s32.totalorder %s2719_s12, %s2197_s11 }
 0x460   : > { %p2199_p3 = pnand %p2198_p10, %p2522_p5 }
 0x461   : > { %1073 = vrot.lane.b32.xlu0 %v2602_v10, %s2319_s29  ;;  %s2724_s29 = scalar_lea.hbm %s2812_s6, %s1706_s20 }
 0x462   : > { %p2200_p7 = pneg %p2199_p3 }
 0x4d4   : > { %v956_v11 = vpop.xlane.xlu0 %955 }
 0x4d5   : > { %v958_v14 = vsub.f32 %v1802_v3, %v956_v11  ;;  %v953_v15 = vpop.xlane.xlu1 %952 }
 0x4d6   : > { %v957_v16 = vsub.f32 %v942_v4, %v953_v15 }
 0x4d7   : > { %v961_v17 = vmul.f32 1.442695, %v958_v14 }
 0x4d8   : > { %v959_v18 = vmul.f32 1.442695, %v957_v16  ;;  %v2038_v20 = vpop.permute.xlu0 %2037 }
 0x4d9   : > { %v2040_v23 = vunpack.i.h.bf16 %v2038_v20  ;;  %v2039_v24 = vunpack.i.l.bf16 %v2038_v20  ;;  %v1072_v27 = vpop.permute.xlu1 %1071 }
 0x4da   : > { %2059 = vpow2.f32 %v959_v18 }
 0x4db   : > { %2061 = vpow2.f32 %v961_v17  ;;  %v1880_v12 = vpack.c.bf16 %v2040_v23, %v2039_v24  ;;  %v1290_v23 = vld [vmem:[#allocation9 + $0x10] sm:$0xff]  ;;  %v1291_v24 = vld [vmem:[#allocation9 + $0x18] sm:$0xff] }
 0x4dc   : > { %v1074_v28 = vpop.permute.xlu0 %1073 }
 0x4dd   : > { %1881 = vmatprep.subr.bf16.mxu1 %v1880_v12 }
 0x4de   : > { %1883 = vmatpush3.bf16.msra.mxu1 %v1880_v12  ;;  %v1898_v12 = vpack.c.bf16 %v1291_v24, %v1290_v23 }
 0x4df   : > { %1886 = vmatprep.subr.msk.bf16.mxu1 %vm2619_vm2, %v1884_v25 }
 0x4e4   : > { %v2060_v10 = vpop.eup %2059 }
 0x4e5   : > { %v2062_v26 = vpop.eup %2061  ;;  %1807 = vmatprep.mubr.msk.f32.mxu1 %vm537_vm3, %v2060_v10  ;;  %v963_v36 = vsel %vm537_vm3, %v2060_v10, 0.0 }
 0x4e6   : > { %1808 = vmatmul.mubr.msk.f32.vlgmr.msra.gmra.mrb[6].mxu1 %vm537_vm3, %v2062_v26  ;;  %v966_v37 = vsel %vm537_vm3, %v2062_v26, 0.0 }
 0x4e7   : > { %1889 = vmatpush3.bf16.xpose.msk.msra.mxu1 %vm2619_vm2, %v1884_v25  ;;  %1814 = vmatprep.mubr.msk.f32.mxu1 %vm453_vm1, %v1072_v27  ;;  %v1285_v25 = vld [vmem:[#allocation8 + $0x8] sm:$0xff] }
 0x4ee   : > { %1815 = vmatmul.mubr.msk.f32.vlgmr.msra.gmra.mrb[8].mxu1 %vm453_vm1, %v1074_v28 }
 0x5b9   : > { %v1809_v29 = vpop.f32.mrb[6].mxu1 }
 0x5ba   : > { %v2681_v30 = vpop.f32.mrb[7].mxu1 }
 0x5c1   : > { %v1816_v31 = vpop.f32.mrb[8].mxu1 }
 0x5c2   : > { %v1153_v32 = vpop.f32.mrb[9].mxu1  ;;  %v1165_v33 = vsel %vm537_vm3, %v1816_v31, -inf }
 0x5c3   : > { %1166 = vmax.xlane.f32.xlu0 %v1165_v33  ;;  %v1162_v34 = vsel %vm537_vm3, %v1153_v32, -inf }
 0x5c4   : > { %1163 = vmax.xlane.f32.xlu1 %v1162_v34 }
 0x5c8   : > { %753 = vadd.xlane.f32.xlu1 %v752_v35  ;;  %v1286_v35 = vld [vmem:[#allocation8 + $0x10] sm:$0xff] }
 0x5cc   : > { %756 = vadd.xlane.f32.xlu1 %v755_v19  ;;  %v1287_v19 = vld [vmem:[#allocation8 + $0x18] sm:$0xff] }
 0x5d0   : > { %964 = vadd.xlane.f32.xlu1 %v963_v36  ;;  %v1906_v36 = vpack.c.bf16 %v1287_v19, %v1286_v35 }
 0x5d4   : > { %967 = vadd.xlane.f32.xlu1 %v966_v37 }
 0x5d9   : > { %2047 = vrot.lane.b32.xlu0 %v2611_v13, %s2321_s8  ;;  %s2325_s8 = smov [#allocation11]  }
 0x5f8   : > { %551 = vadd.xlane.f32.xlu0 %v550_v38  ;;  %v1697_v38 = vld [vmem:[%s2811_s5] ss:$0 sm:$0xff] }
 0x650   : > { %v1167_v39 = vpop.xlane.xlu0 %1166 }
 0x651   : > { %v1169_v40 = vsub.f32 %v1816_v31, %v1167_v39  ;;  %v1164_v41 = vpop.xlane.xlu1 %1163 }
 0x652   : > { %v1168_v42 = vsub.f32 %v1153_v32, %v1164_v41 }
 0x653   : > { %v1172_v43 = vmul.f32 1.442695, %v1169_v40 }
 0x654   : > { %v1170_v44 = vmul.f32 1.442695, %v1168_v42  ;;  %v2048_v45 = vpop.permute.xlu0 %2047 }
 0x655   : > { %v2050_v46 = vunpack.i.h.bf16 %v2048_v45  ;;  %v2049_v47 = vunpack.i.l.bf16 %v2048_v45  ;;  %v754_v48 = vpop.xlane.xlu1 %753 }
 0x656   : > { %2063 = vpow2.f32 %v1170_v44 }
 0x657   : > { %2065 = vpow2.f32 %v1172_v43  ;;  %v1890_v49 = vpack.c.bf16 %v2050_v46, %v2049_v47 }
 0x659   : > { %1891 = vmatprep.subr.bf16.mxu0 %v1890_v49  ;;  %v757_v51 = vpop.xlane.xlu1 %756 }
 0x65a   : > { %1893 = vmatpush3.bf16.msra.mxu0 %v1890_v49 }
 0x65d   : > { %v965_v13 = vpop.xlane.xlu1 %964 }
 0x660   : > { %v2064_v52 = vpop.eup %2063 }
 0x661   : > { %v2066_v50 = vpop.eup %2065  ;;  %1821 = vmatprep.mubr.msk.f32.mxu0 %vm537_vm3, %v2064_v52  ;;  %v968_v54 = vpop.xlane.xlu1 %967  ;;  %v1174_v55 = vsel %vm537_vm3, %v2064_v52, 0.0 }
 0x662   : > { %2067 = vrcp.f32 %v968_v54  ;;  %1822 = vmatmul.mubr.msk.f32.vlgmr.msra.gmra.mrb[6].mxu0 %vm537_vm3, %v2066_v50  ;;  %1175 = vadd.xlane.f32.xlu1 %v1174_v55  ;;  %v1177_v56 = vsel %vm537_vm3, %v2066_v50, 0.0 }
 0x663   : > { %2069 = vrcp.f32 %v754_v48 }
 0x664   : > { %2071 = vrcp.f32 %v757_v51 }
 0x665   : > { %2073 = vrcp.f32 %v965_v13 }
 0x666   : > { %1178 = vadd.xlane.f32.xlu1 %v1177_v56 }
 0x66a   : > { %554 = vadd.xlane.f32.xlu1 %v553_v57 }
 0x66c   : > { %v2068_v58 = vpop.eup %2067 }
 0x66d   : > { %v1059_v59 = vmul.f32 %v2068_v58, %v1809_v29  ;;  %v2070_v60 = vpop.eup %2069 }
 0x66e   : > { %v847_v61 = vmul.f32 %v2070_v60, %v2666_v2  ;;  %v2072_v62 = vpop.eup %2071 }
 0x66f   : > { %1064 = vrot.lane.b32.xlu0 %v1059_v59, %s2322_s30  ;;  %v848_v3 = vmul.f32 %v2072_v62, %v2664_v1  ;;  %v2074_v4 = vpop.eup %2073 }
 0x670   : > { %v1058_v53 = vmul.f32 %v2074_v4, %v2681_v30 }
 0x67b   : > { %851 = vrot.lane.b32.xlu1 %v847_v61, %s2323_s9 }
 0x67f   : > { %853 = vrot.lane.b32.xlu1 %v848_v3, %s2323_s9 }
 0x683   : > { %1062 = vrot.lane.b32.xlu1 %v1058_v53, %s2322_s30  ;;  %s2201_s30 = sshll.u32 %s2325_s8, 4  ;;  %s2202_s30 = int_to_ptr.vmem [resolvable:$false] %s2201_s30 }
 0x684   : > { %p2204_p12 = scmp.lt.s32.totalorder %s2719_s12, %s2202_s30 }
 0x685   : > { %v552_v6 = vpop.xlane.xlu0 %551 }
 0x686   : > { %2075 = vrcp.f32 %v552_v6 }
 0x690   : > { %v2076_v8 = vpop.eup %2075 }
 0x691   : > { %v645_v9 = vmul.f32 %v2076_v8, %v2662_v0  ;;  %v1288_v0 = vld [vmem:[#allocation9] sm:$0xff] }
 0x692   : > { %v1894_v22 = vpack.c.bf16 %v1289_v21, %v1288_v0 }
 0x693   : > { %647 = vst.msk [vmem:[#allocation2] sm:$0xff] %vm453_vm1, %v645_v9 }
 0x694   : > { %1895 = vmatprep.subr.bf16.mxu0 %v1894_v22 }
 0x695   : > { %1897 = vmatpush3.bf16.msra.mxu0 %v1894_v22 }
 0x696   : > { %1899 = vmatprep.subr.bf16.mxu0 %v1898_v12 }
 0x699   : > { %1901 = vmatpush3.bf16.msra.mxu0 %v1898_v12 }
 0x6e1   : > { %v1065_v20 = vpop.permute.xlu0 %1064 }
 0x6ef   : > { %v1176_v2 = vpop.xlane.xlu1 %1175 }
 0x6f3   : > { %v1179_v11 = vpop.xlane.xlu1 %1178 }
 0x6f7   : > { %v555_v14 = vpop.xlane.xlu1 %554 }
 0x6f8   : > { %2077 = vrcp.f32 %v555_v14 }
 0x6f9   : > { %2079 = vrcp.f32 %v1176_v2 }
 0x6fa   : > { %2081 = vrcp.f32 %v1179_v11 }
 0x6fb   : > { %v852_v15 = vpop.permute.xlu1 %851 }
 0x6fc   : > { %858 = vst.msk [vmem:[#allocation2] sm:$0xff] %vm857_vm4, %v852_v15 }
 0x6ff   : > { %v854_v1 = vpop.permute.xlu1 %853 }
 0x702   : > { %v2078_v16 = vpop.eup %2077 }
 0x703   : > { %v646_v17 = vmul.f32 %v2078_v16, %v2660_v63  ;;  %v1063_v18 = vpop.permute.xlu1 %1062  ;;  %v1284_v63 = vld [vmem:[#allocation8] sm:$0xff]  ;;  %v2080_v27 = vpop.eup %2079 }
 0x704   : > { %1069 = vst.msk [vmem:[#allocation2] sm:$0xff] %vm1068_vm5, %v1063_v18  ;;  %v1902_v26 = vpack.c.bf16 %v1285_v25, %v1284_v63  ;;  %v2082_v30 = vpop.eup %2081 }
 0x705   : > { %648 = vst.msk [vmem:[#allocation2 + $0x8] sm:$0xff] %vm453_vm1, %v646_v17 }
 0x706   : > { %859 = vst.msk [vmem:[#allocation2 + $0x8] sm:$0xff] %vm857_vm4, %v854_v1  ;;  %1903 = vmatprep.subr.bf16.mxu0 %v1902_v26 }
 0x707   : > { %1070 = vst.msk [vmem:[#allocation2 + $0x8] sm:$0xff] %vm1068_vm5, %v1065_v20 }
 0x735   : > { %v1823_v10 = vpop.f32.mrb[6].mxu0 }
 0x736   : > { %v1258_v28 = vpop.f32.mrb[7].mxu0  ;;  %v1270_v31 = vmul.f32 %v2082_v30, %v1823_v10 }
 0x737   : > { %v1269_v29 = vmul.f32 %v2080_v27, %v1258_v28 }
 0x739   : > { %1273 = vrot.lane.b32.xlu1 %v1269_v29, %s2324_s13 }
 0x73d   : > { %1275 = vrot.lane.b32.xlu1 %v1270_v31, %s2324_s13  ;;  %s2203_s13 = scalar_lea.vmem %s2202_s30, 512 }
 0x73e   : > { %p2205_p1 = scmp.lt.s32.totalorder %s2203_s13, %s2197_s11 }
 0x740   : > { %p2206_p2 = por %p2205_p1, %p2204_p12 }
 0x742   : > { %p2207_p4 = pnand %p2206_p2, %p2200_p7 }
 0x7ab   : > { %v1274_v32 = vpop.permute.xlu1 %1273 }
 0x7ac   : > { %1280 = vst.msk [vmem:[#allocation2] sm:$0xff] %vm1279_vm6, %v1274_v32 }
 0x7af   : > { %v1276_v33 = vpop.permute.xlu1 %1275 }
 0x7b0   : > { %1281 = vst.msk [vmem:[#allocation2 + $0x8] sm:$0xff] %vm1279_vm6, %v1276_v33 }
 0x7b3   : > { %v1282_v34 = vld [vmem:[#allocation2] sm:$0xff] }
 0x7b4   : > { %1832 = vmatprep.mubr.msk.f32.mxu0 %vm365_vm0, %v1282_v34 }
 0x7b7   : > { %v1283_v37 = vld [vmem:[#allocation2 + $0x8] sm:$0xff] }
 0x7b8   : > { %1833 = vmatmul.mubr.msk.f32.vlgmr.msra.gmra.mrb[8].mxu0 %vm365_vm0, %v1283_v37 }
 0x7b9   : > { %1905 = vmatpush3.bf16.msra.mxu0 %v1902_v26  ;;  %1843 = vmatprep.mubr.msk.f32.mxu0 %vm365_vm0, %v2591_v5 }
 0x7ba   : > { %1907 = vmatprep.subr.bf16.mxu0 %v1906_v36 }
 0x7bd   : > { %1909 = vmatpush3.bf16.msra.mxu0 %v1906_v36 }
 0x7c0   : > { %1844 = vmatmul.mubr.msk.f32.vlgmr.msra.gmra.mrb[8].mxu0 %vm365_vm0, %v2595_v7 }
 0x893   : > { %v1845_v39 = vpop.f32.mrb[8].mxu0 }
 0x894   : > { %v1456_v40 = vadd.f32 %v1845_v39, %v1697_v38  ;;  %v1439_v5 = vpop.f32.mrb[9].mxu0 }
 0x895   : > { %v1455_v41 = vadd.f32 %v1697_v38, %v1439_v5 }
 0x896   : > { %1459 = vst.msk [vmem:[%s344_s14 + $0x8] sm:$0xff] %vm1457_vm7, %v1456_v40  ;;  %v1461_v7 = vsel %vm1457_vm7, %v1456_v40, 0.0  ;;  %v1470_v42 = vmul.f32 %v1456_v40, %v1456_v40 }
 0x897   : > { %1458 = vst.msk [vmem:[%s344_s14] sm:$0xff] %vm1457_vm7, %v1455_v41  ;;  %v1460_v43 = vsel %vm1457_vm7, %v1455_v41, 0.0  ;;  %v1469_v44 = vmul.f32 %v1455_v41, %v1455_v41 }
 0x898   : > { %v1472_v45 = vsel %vm1457_vm7, %v1470_v42, 0.0  ;;  %v1462_v46 = vadd.f32 %v1461_v7, %v1460_v43 }
 0x899   : > { %2210 = shalt.err (!%p2207_p4)
}
 0x89a   : > { %s2211_s15 = scalar_lea.hbm %s2724_s29, 256  ;;  %s2215_s20 = scalar_lea.hbm %s2812_s6, 512 }
 0x89b   : > { %p2212_p9 = scmp.ne.s32.totalorder %s2724_s29, %s2211_s15  ;;  %p2216_p8 = scmp.lt.u32.totalorder %s2724_s29, %s2812_s6 }
 0x89c   : > { %p2217_p13 = scmp.lt.u32.totalorder %s2215_s20, %s2211_s15  ;;  %p2219_p10 = scmp.lt.u32.totalorder %s2211_s15, %s2724_s29 }
 0x89d   : > { %p2213_p0 = pnand %p2212_p9, %p2522_p5 }
 0x89e   : > { %p2218_p6 = por %p2217_p13, %p2216_p8 }
 0x89f   : > { %p2214_p11 = pneg %p2213_p0 }
 0x8a0   : > { %p2220_p3 = por %p2219_p10, %p2218_p6 }
 0x8a2   : > { %p2221_p7 = pnand %p2220_p3, %p2214_p11 }
 0x8a4   : > { %2224 = shalt.err (!%p2221_p7)
}
 0x8a5   : > { %s2326_s11 = smov 128   ;;  %v1471_v47 = vsel %vm1457_vm7, %v1469_v44, 0.0  ;;  %v1463_v48 = vrot.slane %v1462_v46, 4  ;;  %s1665_s8 = sshll.u32 %s2573_s17, 1  ;;  %vm1480_vm8 = vcmask 1040384   ;;  %vm1482_vm9 = vcmask 517120  }
 0x8a6   : > { %1926 = dma.vmem_to_hbm [thread:$0]  (%p2522_p5), %s2719_s12, 256, %s2724_s29, %s1485_s23, %s2326_s11, %s2326_s11, %s2323_s9   ;;  %v1473_v49 = vadd.f32 %v1472_v45, %v1471_v47 }
 0x8a7   : > { %v1464_v51 = vadd.f32 %v1463_v48, %v1462_v46  ;;  %s1702_s30 = sshll.u32 %s2389_s28, 5  ;;  %s351_s13 = scalar_lea.vmem [#allocation12], %s1665_s8 }
 0x8a8   : > { %v1474_v13 = vrot.slane %v1473_v49, 4  ;;  %s1519_s15 = sshll.u32 %s351_s13, 4  ;;  %s2762_s29 = scalar_lea.hbm %s2813_s7, %s1702_s30  ;;  %s2764_s15 = int_to_ptr.vmem [resolvable:$true] %s1519_s15 }
 0x8a9   : > { %v1465_v52 = vrot.slane %v1464_v51, 2  ;;  %s1490_s23 = scalar_lea.sflag [#allocation13], %s2573_s17  ;;  %s2225_s28 = scalar_lea.vmem %s2764_s15, 32 }
 0x8aa   : > { %v1475_v50 = vadd.f32 %v1474_v13, %v1473_v49  ;;  %p2226_p12 = scmp.ne.s32.totalorder %s2764_s15, %s2225_s28  ;;  %s2327_s10 = smov [#allocation12]  }
 0x8ab   : > { %v1466_v54 = vadd.f32 %v1465_v52, %v1464_v51  ;;  %s2229_s14 = sshll.u32 %s2327_s10, 4  ;;  %s2230_s14 = int_to_ptr.vmem [resolvable:$false] %s2229_s14 }
 0x8ac   : > { %v1476_v55 = vrot.slane %v1475_v50, 2  ;;  %p2227_p1 = pnand %p2226_p12, %p2522_p5  ;;  %s2231_s20 = scalar_lea.vmem %s2230_s14, 64 }
 0x8ad   : > { %v1467_v56 = vrot.slane %v1466_v54, 1  ;;  %p2232_p4 = scmp.lt.s32.totalorder %s2764_s15, %s2230_s14  ;;  %p2233_p9 = scmp.lt.s32.totalorder %s2231_s20, %s2225_s28 }
 0x8ae   : > { %v1477_v57 = vadd.f32 %v1476_v55, %v1475_v50  ;;  %p2228_p2 = pneg %p2227_p1 }
 0x8af   : > { %v1468_v59 = vadd.f32 %v1467_v56, %v1466_v54  ;;  %p2234_p0 = por %p2233_p9, %p2232_p4 }
 0x8b0   : > { %v1478_v58 = vrot.slane %v1477_v57, 1 }
 0x8b1   : > { %p2235_p11 = pnand %p2234_p0, %p2228_p2 }
 0x8b2   : > { %v1479_v60 = vadd.f32 %v1478_v58, %v1477_v57 }
 0x8b4   : > { %v1481_v61 = vsel %vm1480_vm8, %v1468_v59, %v1479_v60 }
 0x8b5   : > { %1483 = vst.msk [vmem:[%s351_s13] sm:$0x3] %vm1482_vm9, %v1481_v61 }
 0x8b6   : > { %2238 = shalt.err (!%p2235_p11)
}
 0x8b7   : > { %s2239_s17 = scalar_lea.hbm %s2762_s29, 32  ;;  %s2243_s11 = scalar_lea.hbm %s2813_s7, 64 }
 0x8b8   : > { %p2240_p8 = scmp.ne.s32.totalorder %s2762_s29, %s2239_s17  ;;  %p2244_p10 = scmp.lt.u32.totalorder %s2762_s29, %s2813_s7 }
 0x8b9   : > { %p2245_p3 = scmp.lt.u32.totalorder %s2243_s11, %s2239_s17  ;;  %p2247_p12 = scmp.lt.u32.totalorder %s2239_s17, %s2762_s29 }
 0x8ba   : > { %p2241_p13 = pnand %p2240_p8, %p2522_p5 }
 0x8bb   : > { %p2246_p7 = por %p2245_p3, %p2244_p10 }
 0x8bc   : > { %p2242_p6 = pneg %p2241_p13 }
 0x8bd   : > { %p2248_p1 = por %p2247_p12, %p2246_p7 }
 0x8bf   : > { %p2249_p2 = pnand %p2248_p1, %p2242_p6 }
 0x8c1   : > { %2252 = shalt.err (!%p2249_p2)
}
 0x8c2   : > { %1927 = dma.vmem_to_hbm [thread:$0]  (%p2522_p5), %s2764_s15, 32, %s2762_s29, %s1490_s23  }
 0x8c3 PF: > { %s2835_s13 = sld [smem:[#allocation19_spill]]  ;;  %s1531_s9 = sand.u32 1, %s2291_s24  }
 0x8c4   : > { %p2837_p9 = scmp.ge.s32.totalorder %s2303_s27, 2  ;;  %s1532_s12 = scalar_lea.sflag [#allocation5], %s1531_s9 }
 0x8c9   : > { %p2836_p4 = scmp.ne.s32.totalorder %s2835_s13, 0 }
 0x8cb   : > { %p1945_p0 = pnand %p2837_p9, %p2836_p4 }
 0x8cd   : > { %2282 = dma.done.wait (!%p1945_p0), %s1532_s12, 256  }
 0x8ce   : > { %2284 = vsyncadd (!%p1945_p0), %s1532_s12, 4294967040  ;;  %s1541_s28 = scalar_lea.sflag [#allocation13], %s1531_s9 }
 0x8cf   : > { %2286 = dma.done.wait (!%p1945_p0), %s1541_s28, 32  }
 0x8d0   : > { %2288 = vsyncadd (!%p1945_p0), %s1541_s28, 4294967264  ;;  %p26_p5 = scmp.ge.s32.totalorder %s2508_s22, 4   ;;  %s2838_s24 = smov %s2295_s25 }
 0x8d1   : > { %s2839_s25 = smov %s2299_s26  ;;  %s2840_s26 = smov %s2518_s18 }
 0x8d2   : > { %s2841_s27 = smov %s2508_s22  ;;  %28 = sbr.rel (!%p26_p5) target bundleno = 9 (0x9), region = 118 }
 0x8d9   :  { %1546 = vsyncpa [#allocation4], 1 }
 0x8da   :  { %1548 = vsyncpa [#allocation4 + $0x1], 1 }
 0x8db   :  { %1549 = vsyncpa [#allocation7], 1 }
 0x8dc   :  { %1550 = vsyncpa [#allocation10], 1 }
 0x8dd   :  { %1551 = vsyncpa [#allocation5], 1 }
 0x8de   :  { %1553 = vsyncpa [#allocation5 + $0x1], 1 }
 0x8df   :  { %1554 = vsyncpa [#allocation13], 1 }
 0x8e0   :  { %1556 = vsyncpa [#allocation13 + $0x1], 1 }

</bundles_post_ra>
